<compile_context>
chip_gen: v7x
topology: tpu7x:2x2x1
jax: 0.10.0
libtpu: 0.0.40
codegen_flags: <defaults>
</compile_context>

<pallas_src>
import functools
import math

import jax
import jax.numpy as jnp
from jax.experimental import pallas as pl
from jax.experimental.pallas import tpu as pltpu


def _round_up(x, m):
    return ((x + m - 1) // m) * m


# ----------------------------- Pallas kernel ------------------------------

def _tt_dense_kernel(x_ref, w_ref, b_ref, o_ref):
    """o = x @ W + bias for one batch tile.

    x_ref: (TILE_B, p_in)  VMEM (pipelined over the batch grid axis)
    w_ref: (p_in, p_out)   VMEM (same block every step -> stays resident)
    b_ref: (1, p_out)      VMEM (resident)
    o_ref: (TILE_B, p_out) VMEM
    """
    acc = jnp.dot(x_ref[...], w_ref[...], preferred_element_type=jnp.float32)
    o_ref[...] = (acc + b_ref[...]).astype(o_ref.dtype)


# ----------------------------- wrapper ------------------------------

def _tt_dense_weight(cores, mat_ranks, inp_modes, out_modes):
    """Collapse the TT chain into the dense weight M with forward(x) = x @ M + bias.

    This is exactly the reference per-stage chain applied to the identity matrix, so the
    resulting linear map is identical to TTLinear.forward (up to float reassociation).
    """
    dim = len(inp_modes)
    p_in = math.prod(inp_modes)
    p_out = math.prod(out_modes)
    out = jnp.eye(p_in, dtype=jnp.float32)          # "x" with batch = p_in
    for i in range(dim):
        out = out.reshape(mat_ranks[i] * inp_modes[i], -1)
        out = jnp.dot(cores[i].astype(jnp.float32), out,
                      precision=jax.lax.Precision.HIGHEST)
        out = out.reshape(out_modes[i], -1).T
    return out.reshape(p_in, p_out)                 # row j == forward(e_j) (no bias)


def tt_linear_forward(x, cores, biases, mat_ranks, inp_modes, out_modes, tile_b=2048):
    """TTLinear.forward: x (..., prod(inp_modes)) -> (batch, prod(out_modes))."""
    dim = len(inp_modes)
    assert len(out_modes) == dim and len(mat_ranks) == dim + 1
    assert mat_ranks[0] == 1 and mat_ranks[-1] == 1, "TT boundary ranks must be 1"
    p_in = math.prod(inp_modes)
    p_out = math.prod(out_modes)

    # Dense-collapse path only when W comfortably fits in VMEM (see TODO above).
    assert p_in * p_out * 4 <= 4 * 1024 * 1024, "dense W too large; need staged TT kernel"

    w = _tt_dense_weight(cores, mat_ranks, inp_modes, out_modes)        # (p_in, p_out)
    bias = (biases if biases is not None
            else jnp.zeros((p_out,), jnp.float32)).astype(jnp.float32).reshape(1, p_out)

    x2 = x.reshape(-1, p_in).astype(jnp.float32)                        # natural layout
    batch = x2.shape[0]

    # Batch tile: as large as possible (cap = tile_b), but keep >= 2 grid steps so the
    # "parallel" axis can use both TensorCores on v7x.  Sublane-align to 8.
    tb = min(tile_b, max(8, _round_up((batch + 1) // 2, 8)))
    tb = _round_up(tb, 8)
    b_pad = _round_up(batch, tb)
    if b_pad != batch:
        x2 = jnp.pad(x2, ((0, b_pad - batch), (0, 0)))

    grid = (b_pad // tb,)

    # Scoped-VMEM budget: double-buffered x + out blocks, resident W and bias, + slack.
    working_set = 2 * (tb * p_in * 4) + 2 * (tb * p_out * 4) + p_in * p_out * 4 + p_out * 4
    vmem_limit = int(min(max(2 * working_set, 16 * 1024 * 1024), 64 * 1024 * 1024))

    out = pl.pallas_call(
        _tt_dense_kernel,
        out_shape=jax.ShapeDtypeStruct((b_pad, p_out), jnp.float32),
        grid=grid,
        in_specs=[
            pl.BlockSpec((tb, p_in), lambda b: (b, 0)),       # batch tile of x
            pl.BlockSpec((p_in, p_out), lambda b: (0, 0)),    # resident dense weight
            pl.BlockSpec((1, p_out), lambda b: (0, 0)),       # resident bias
        ],
        out_specs=pl.BlockSpec((tb, p_out), lambda b: (b, 0)),
        compiler_params=pltpu.CompilerParams(
            dimension_semantics=("parallel",),
            vmem_limit_bytes=vmem_limit,
        ),
    )(x2, w, bias)

    if b_pad != batch:
        out = out[:batch]
    return out


# ----------------------------- params / reference ------------------------------

def init_tt_linear_params(key, mat_ranks, inp_modes, out_modes):
    """Mirror the PyTorch __init__ shapes: xavier-normal cores, zero bias."""
    dim = len(inp_modes)
    cores = []
    for i in range(dim):
        shape = (out_modes[i] * mat_ranks[i + 1], mat_ranks[i] * inp_modes[i])
        key, sub = jax.random.split(key)
        fan_out, fan_in = shape
        std = math.sqrt(2.0 / (fan_in + fan_out))          # xavier_normal_, gain=1
        cores.append(std * jax.random.normal(sub, shape, dtype=jnp.float32))
    biases = jnp.zeros((math.prod(out_modes),), dtype=jnp.float32)
    return cores, biases


def tt_linear_reference(x, cores, biases, mat_ranks, inp_modes, out_modes):
    """Pure-jnp port of TTLinear.forward (correctness oracle)."""
    dim = len(inp_modes)
    p_in = math.prod(inp_modes)
    p_out = math.prod(out_modes)
    out = x.reshape(-1, p_in).T
    for i in range(dim):
        out = out.reshape(mat_ranks[i] * inp_modes[i], -1)
        out = jnp.dot(cores[i], out, precision=jax.lax.Precision.HIGHEST)
        out = out.reshape(out_modes[i], -1).T
    out = out.reshape(-1, p_out)
    if biases is not None:
        out = out + biases
    return out


# ----------------------------------- main -----------------------------------

if __name__ == "__main__":
    # TT-linear: 64 -> 32 features factored as 4*4*4 -> 4*4*2, TT-ranks (1,2,2,1).
    inp_modes = (4, 4, 4)
    out_modes = (4, 4, 2)
    mat_ranks = (1, 2, 2, 1)
    batch = 1024                      # tile_b picks 512 -> grid=(2,) (both TCs on v7x)

    key = jax.random.PRNGKey(0)
    key, k_x, k_w, k_b = jax.random.split(key, 4)

    x = jax.random.normal(k_x, (batch, math.prod(inp_modes)), dtype=jnp.float32)
    cores, biases = init_tt_linear_params(k_w, mat_ranks, inp_modes, out_modes)
    # Use a non-zero bias so the fused bias epilogue is actually exercised.
    biases = 0.1 * jax.random.normal(k_b, biases.shape, dtype=jnp.float32)

    fwd = jax.jit(functools.partial(
        tt_linear_forward,
        mat_ranks=mat_ranks, inp_modes=inp_modes, out_modes=out_modes))

    out = jax.block_until_ready(fwd(x, cores, biases))

    ref = tt_linear_reference(x, cores, biases, mat_ranks, inp_modes, out_modes)
    assert out.shape == (batch, math.prod(out_modes)), out.shape
    max_err = float(jnp.max(jnp.abs(out - ref)))
    assert jnp.allclose(out, ref, atol=5e-3, rtol=5e-3), \
        f"mismatch vs reference (max abs err {max_err})"

    print("KERNEL_OK")
</pallas_src>

<mosaic_0001>
module attributes {stable_mosaic.version = 11 : i64} {
  func.func @_tt_dense_kernel(%arg0: i32, %arg1: memref<512x64xf32, #tpu.memory_space<vmem>>, %arg2: memref<64x32xf32, #tpu.memory_space<vmem>>, %arg3: memref<1x32xf32, #tpu.memory_space<vmem>>, %arg4: memref<512x32xf32, #tpu.memory_space<vmem>>) attributes {dimension_semantics = [#tpu.dimension_semantics<parallel>], iteration_bounds = array<i64: 2>, scalar_prefetch = 0 : i64, scratch_operands = 0 : i64, tpu.core_type = #tpu.core_type<tc>, window_params = [{transform_indices = @transform_0, window_bounds = array<i64: 512, 64>}, {pipeline_mode = #tpu.pipeline_mode<synchronous>, transform_indices = @transform_1, window_bounds = array<i64: 64, 32>}, {pipeline_mode = #tpu.pipeline_mode<synchronous>, transform_indices = @transform_2, window_bounds = array<i64: 1, 32>}, {transform_indices = @transform_3, window_bounds = array<i64: 512, 32>}]} {
    %c0 = arith.constant 0 : index
    %c0_0 = arith.constant 0 : index
    %0 = vector.load %arg1[%c0, %c0_0] : memref<512x64xf32, #tpu.memory_space<vmem>>, vector<512x64xf32>
    %c0_1 = arith.constant 0 : index
    %c0_2 = arith.constant 0 : index
    %1 = vector.load %arg2[%c0_1, %c0_2] : memref<64x32xf32, #tpu.memory_space<vmem>>, vector<64x32xf32>
    %cst = arith.constant dense<0.000000e+00> : vector<512x32xf32>
    %2 = tpu.matmul %0, %1, %cst {dimension_numbers = #tpu.dot_dimension_numbers<[1], [0], [0], [1], [0, 0, 1, 1], [], []>} : vector<512x64xf32>, vector<64x32xf32>, vector<512x32xf32> -> vector<512x32xf32>
    %c0_3 = arith.constant 0 : index
    %c0_4 = arith.constant 0 : index
    %3 = vector.load %arg3[%c0_3, %c0_4] : memref<1x32xf32, #tpu.memory_space<vmem>>, vector<1x32xf32>
    %4 = vector.broadcast %3 : vector<1x32xf32> to vector<512x32xf32>
    %5 = arith.addf %2, %4 : vector<512x32xf32>
    %c0_5 = arith.constant 0 : index
    %c0_6 = arith.constant 0 : index
    %6 = vector.load %arg4[%c0_5, %c0_6] : memref<512x32xf32, #tpu.memory_space<vmem>>, vector<512x32xf32>
    tpu.vector_store %arg4[%c0_5, %c0_6], %5 {strides = array<i32>} : memref<512x32xf32, #tpu.memory_space<vmem>>, vector<512x32xf32>,
    return
  }
  func.func @transform_0(%arg0: i32) -> (i32, i32) {
    %c0_i32 = arith.constant 0 : i32
    %c0_i32_0 = arith.constant 0 : i32
    return %arg0, %c0_i32 : i32, i32
  }
  func.func @transform_1(%arg0: i32) -> (i32, i32) {
    %c0_i32 = arith.constant 0 : i32
    %c0_i32_0 = arith.constant 0 : i32
    %c0_i32_1 = arith.constant 0 : i32
    return %c0_i32, %c0_i32_0 : i32, i32
  }
  func.func @transform_2(%arg0: i32) -> (i32, i32) {
    %c0_i32 = arith.constant 0 : i32
    %c0_i32_0 = arith.constant 0 : i32
    %c0_i32_1 = arith.constant 0 : i32
    return %c0_i32, %c0_i32_0 : i32, i32
  }
  func.func @transform_3(%arg0: i32) -> (i32, i32) {
    %c0_i32 = arith.constant 0 : i32
    %c0_i32_0 = arith.constant 0 : i32
    return %arg0, %c0_i32 : i32, i32
  }
}

</mosaic_0001>

<bundles_post_ra>
// kernel: tt_linear_forward.1
= control target key start
LH: loop header
LB: loop body
LE: loop exit
PB: predicated region body
PF: predicated region fallthrough
CT: control target
= control target key end

     0   :  { %s1272_s12 = smov 0   ;;  %s1649_s0 = inlined_call_operand.vmem [shape: f32[1024,64], index: 0, kind: input, shape index: {}]   ;;  %s1650_s1 = inlined_call_operand.vmem [shape: f32[64,32], index: 1, kind: input, shape index: {}]   ;;  %s1651_s2 = inlined_call_operand.vmem [shape: f32[1,32], index: 2, kind: input, shape index: {}]   ;;  %s1652_s3 = inlined_call_operand.vmem [shape: f32[1024,32], index: 3, kind: output, shape index: {}]  }
   0x1 LB: > { %s952_s13 = sadd.s32 4294967295, %s1250_s12   ;;  %p956_p0 = scmp.ge.s32.totalorder %s1250_s12, 1  ;;  %s1250_s12 = sphi %s1272_s12, %s13_s12  }
   0x2   : > { %p138_p1 = scmp.lt.s32.totalorder %s1250_s12, 3 }
   0x4   : > { %p139_p2 = pnand %p956_p0, %p138_p1 }
   0x5   : > { %v238_v0 = vld [vmem:[%s1650_s1] sm:$0xff] (!%p139_p2)  ;;  %v239_v1 = vld [vmem:[%s1650_s1 + $0x8] sm:$0xff] (!%p139_p2)  ;;  %v240_v2 = vld [vmem:[%s1650_s1 + $0x10] sm:$0xff] (!%p139_p2)  ;;  %s957_s20 = sshll.u32 (!%p139_p2), %s952_s13, 6  ;;  %vm253_vm0 = vcmask (!%p139_p2), 523264   ;;  %vm831_vm1 = vcmask (!%p139_p2), 261120  }
   0x6   : > { %142 = sbr.rel (%p139_p2) target bundleno = 301 (0x12d), region = 32  ;;  %v1212_v3 = vpack.c.bf16 (!%p139_p2), %v239_v1, %v238_v0  ;;  %v241_v4 = vld [vmem:[%s1650_s1 + $0x18] sm:$0xff] (!%p139_p2)  ;;  %p163_p3 = scmp.lt.s32.totalorder (!%p139_p2), %s957_s20, 127  ;;  %v242_v6 = vld [vmem:[%s1650_s1 + $0x20] sm:$0xff] (!%p139_p2)  ;;  %v243_v7 = vld [vmem:[%s1650_s1 + $0x28] sm:$0xff] (!%p139_p2) }
   0x7   : > { %v1216_v5 = vpack.c.bf16 (!%p139_p2), %v241_v4, %v240_v2  ;;  %v1220_v8 = vpack.c.bf16 (!%p139_p2), %v243_v7, %v242_v6  ;;  %v244_v9 = vld [vmem:[%s1650_s1 + $0x30] sm:$0xff] (!%p139_p2)  ;;  %v245_v10 = vld [vmem:[%s1650_s1 + $0x38] sm:$0xff] (!%p139_p2) }
   0x8   : > { %1213 = vmatprep.subr.bf16.mxu0 (!%p139_p2), %v1212_v3  ;;  %1228 = vmatprep.subr.bf16.mxu1 (!%p139_p2), %v1212_v3  ;;  %v1224_v13 = vpack.c.bf16 (!%p139_p2), %v245_v10, %v244_v9 }
   0x9   : > { %1215 = vmatpush3.bf16.msra.mxu0 (!%p139_p2), %v1212_v3  ;;  %1232 = vmatpush3.bf16.msra.mxu1 (!%p139_p2), %v1212_v3 }
   0xa   : > { %1217 = vmatprep.subr.bf16.mxu0 (!%p139_p2), %v1216_v5  ;;  %1229 = vmatprep.subr.bf16.mxu1 (!%p139_p2), %v1216_v5 }
   0xd   : > { %s1654_s20 = smov (!%p163_p3, %s957_s20), 127  ;;  %1219 = vmatpush3.bf16.msra.mxu0 %v1216_v5  ;;  %1233 = vmatpush3.bf16.msra.mxu1 %v1216_v5 }
   0xe   : > { %s958_s27 = sshll.u32 %s1654_s20, 3  ;;  %1221 = vmatprep.subr.bf16.mxu0 %v1220_v8  ;;  %1230 = vmatprep.subr.bf16.mxu1 %v1220_v8 }
   0xf   : > { %s1312_s7 = scalar_lea.vmem %s1649_s0, %s958_s27  ;;  %s1452_s13 = scalar_lea.vmem %s1652_s3, %s958_s27 }
  0x10   : > { %v174_v11 = vld [vmem:[%s1312_s7] sm:$0xff]  ;;  %v175_v14 = vld [vmem:[%s1312_s7 + $0x8] sm:$0xff]  ;;  %v176_v16 = vld [vmem:[%s1312_s7 + $0x10] sm:$0xff] }
  0x11   : > { %v206_v12 = vld [vmem:[%s1312_s7 + $0x100] sm:$0xff]  ;;  %1116 = vmatprep.mubr.msk.f32.mxu0 %vm253_vm0, %v174_v11  ;;  %1223 = vmatpush3.bf16.msra.mxu0 %v1220_v8  ;;  %v207_v15 = vld [vmem:[%s1312_s7 + $0x108] sm:$0xff]  ;;  %v208_v17 = vld [vmem:[%s1312_s7 + $0x110] sm:$0xff] }
  0x12   : > { %1164 = vmatprep.mubr.msk.f32.mxu1 %vm253_vm0, %v206_v12  ;;  %1234 = vmatpush3.bf16.msra.mxu1 %v1220_v8  ;;  %v177_v18 = vld [vmem:[%s1312_s7 + $0x18] sm:$0xff]  ;;  %v178_v20 = vld [vmem:[%s1312_s7 + $0x20] sm:$0xff]  ;;  %v179_v22 = vld [vmem:[%s1312_s7 + $0x28] sm:$0xff] }
  0x13   : > { %1225 = vmatprep.subr.bf16.mxu0 %v1224_v13  ;;  %1231 = vmatprep.subr.bf16.mxu1 %v1224_v13  ;;  %v209_v19 = vld [vmem:[%s1312_s7 + $0x118] sm:$0xff]  ;;  %v210_v21 = vld [vmem:[%s1312_s7 + $0x120] sm:$0xff]  ;;  %v211_v23 = vld [vmem:[%s1312_s7 + $0x128] sm:$0xff] }
  0x14   : > { %v180_v24 = vld [vmem:[%s1312_s7 + $0x30] sm:$0xff]  ;;  %v181_v26 = vld [vmem:[%s1312_s7 + $0x38] sm:$0xff]  ;;  %v182_v28 = vld [vmem:[%s1312_s7 + $0x40] sm:$0xff] }
  0x15   : > { %1227 = vmatpush3.bf16.msra.mxu0 %v1224_v13  ;;  %v212_v25 = vld [vmem:[%s1312_s7 + $0x130] sm:$0xff]  ;;  %v213_v27 = vld [vmem:[%s1312_s7 + $0x138] sm:$0xff]  ;;  %v214_v29 = vld [vmem:[%s1312_s7 + $0x140] sm:$0xff] }
  0x16   : > { %1235 = vmatpush3.bf16.msra.mxu1 %v1224_v13  ;;  %v183_v30 = vld [vmem:[%s1312_s7 + $0x48] sm:$0xff]  ;;  %v184_v32 = vld [vmem:[%s1312_s7 + $0x50] sm:$0xff]  ;;  %v185_v34 = vld [vmem:[%s1312_s7 + $0x58] sm:$0xff] }
  0x17   : > { %v215_v31 = vld [vmem:[%s1312_s7 + $0x148] sm:$0xff]  ;;  %v216_v33 = vld [vmem:[%s1312_s7 + $0x150] sm:$0xff]  ;;  %v217_v35 = vld [vmem:[%s1312_s7 + $0x158] sm:$0xff] }
  0x18   : > { %1117 = vmatmul.mubr.msk.f32.vlgmr.msra.gmra.mrb[0].mxu0 %vm253_vm0, %v175_v14  ;;  %v186_v36 = vld [vmem:[%s1312_s7 + $0x60] sm:$0xff]  ;;  %v187_v38 = vld [vmem:[%s1312_s7 + $0x68] sm:$0xff]  ;;  %v188_v40 = vld [vmem:[%s1312_s7 + $0x70] sm:$0xff] }
  0x19   : > { %1165 = vmatmul.mubr.msk.f32.vlgmr.msra.gmra.mrb[0].mxu1 %vm253_vm0, %v207_v15  ;;  %1119 = vmatprep.mubr.msk.f32.mxu0 %vm253_vm0, %v176_v16  ;;  %v218_v37 = vld [vmem:[%s1312_s7 + $0x160] sm:$0xff]  ;;  %v219_v39 = vld [vmem:[%s1312_s7 + $0x168] sm:$0xff]  ;;  %v220_v41 = vld [vmem:[%s1312_s7 + $0x170] sm:$0xff] }
  0x1a   : > { %1167 = vmatprep.mubr.msk.f32.mxu1 %vm253_vm0, %v208_v17  ;;  %v189_v42 = vld [vmem:[%s1312_s7 + $0x78] sm:$0xff]  ;;  %v190_v44 = vld [vmem:[%s1312_s7 + $0x80] sm:$0xff]  ;;  %v191_v46 = vld [vmem:[%s1312_s7 + $0x88] sm:$0xff] }
  0x1b   : > { %v221_v43 = vld [vmem:[%s1312_s7 + $0x178] sm:$0xff]  ;;  %v222_v45 = vld [vmem:[%s1312_s7 + $0x180] sm:$0xff]  ;;  %v223_v47 = vld [vmem:[%s1312_s7 + $0x188] sm:$0xff] }
  0x1c   : > { %1120 = vmatmul.mubr.msk.f32.gmra.mrb[2].mxu0 %vm253_vm0, %v177_v18  ;;  %v192_v48 = vld [vmem:[%s1312_s7 + $0x90] sm:$0xff]  ;;  %v193_v50 = vld [vmem:[%s1312_s7 + $0x98] sm:$0xff]  ;;  %v194_v52 = vld [vmem:[%s1312_s7 + $0xa0] sm:$0xff] }
  0x1d   : > { %1168 = vmatmul.mubr.msk.f32.gmra.mrb[2].mxu1 %vm253_vm0, %v209_v19  ;;  %1122 = vmatprep.mubr.msk.f32.mxu0 %vm253_vm0, %v178_v20  ;;  %v224_v49 = vld [vmem:[%s1312_s7 + $0x190] sm:$0xff]  ;;  %v225_v51 = vld [vmem:[%s1312_s7 + $0x198] sm:$0xff]  ;;  %v226_v53 = vld [vmem:[%s1312_s7 + $0x1a0] sm:$0xff] }
  0x1e   : > { %1170 = vmatprep.mubr.msk.f32.mxu1 %vm253_vm0, %v210_v21  ;;  %v195_v54 = vld [vmem:[%s1312_s7 + $0xa8] sm:$0xff]  ;;  %v196_v56 = vld [vmem:[%s1312_s7 + $0xb0] sm:$0xff]  ;;  %v197_v58 = vld [vmem:[%s1312_s7 + $0xb8] sm:$0xff] }
  0x1f   : > { %v227_v55 = vld [vmem:[%s1312_s7 + $0x1a8] sm:$0xff]  ;;  %v228_v57 = vld [vmem:[%s1312_s7 + $0x1b0] sm:$0xff]  ;;  %v229_v59 = vld [vmem:[%s1312_s7 + $0x1b8] sm:$0xff] }
  0x20   : > { %1123 = vmatmul.mubr.msk.f32.gmra.mrb[4].mxu0 %vm253_vm0, %v179_v22  ;;  %v198_v60 = vld [vmem:[%s1312_s7 + $0xc0] sm:$0xff]  ;;  %v199_v62 = vld [vmem:[%s1312_s7 + $0xc8] sm:$0xff]  ;;  %v200_v0 = vld [vmem:[%s1312_s7 + $0xd0] sm:$0xff] }
  0x21   : > { %1171 = vmatmul.mubr.msk.f32.gmra.mrb[4].mxu1 %vm253_vm0, %v211_v23  ;;  %1125 = vmatprep.mubr.msk.f32.mxu0 %vm253_vm0, %v180_v24  ;;  %v230_v61 = vld [vmem:[%s1312_s7 + $0x1c0] sm:$0xff]  ;;  %v231_v63 = vld [vmem:[%s1312_s7 + $0x1c8] sm:$0xff]  ;;  %v232_v1 = vld [vmem:[%s1312_s7 + $0x1d0] sm:$0xff] }
  0x22   : > { %1173 = vmatprep.mubr.msk.f32.mxu1 %vm253_vm0, %v212_v25  ;;  %v201_v2 = vld [vmem:[%s1312_s7 + $0xd8] sm:$0xff]  ;;  %v202_v4 = vld [vmem:[%s1312_s7 + $0xe0] sm:$0xff]  ;;  %v203_v6 = vld [vmem:[%s1312_s7 + $0xe8] sm:$0xff] }
  0x23   : > { %v233_v3 = vld [vmem:[%s1312_s7 + $0x1d8] sm:$0xff]  ;;  %v234_v5 = vld [vmem:[%s1312_s7 + $0x1e0] sm:$0xff]  ;;  %v235_v7 = vld [vmem:[%s1312_s7 + $0x1e8] sm:$0xff] }
  0x24   : > { %1126 = vmatmul.mubr.msk.f32.gmra.mrb[6].mxu0 %vm253_vm0, %v181_v26  ;;  %v204_v8 = vld [vmem:[%s1312_s7 + $0xf0] sm:$0xff]  ;;  %v205_v10 = vld [vmem:[%s1312_s7 + $0xf8] sm:$0xff]  ;;  %v1445_v12 = vld [vmem:[%s1651_s2] ss:$0 sm:$0xff] }
  0x25   : > { %1174 = vmatmul.mubr.msk.f32.gmra.mrb[6].mxu1 %vm253_vm0, %v213_v27  ;;  %1128 = vmatprep.mubr.msk.f32.mxu0 %vm253_vm0, %v182_v28  ;;  %v236_v9 = vld [vmem:[%s1312_s7 + $0x1f0] sm:$0xff]  ;;  %v237_v11 = vld [vmem:[%s1312_s7 + $0x1f8] sm:$0xff] }
  0x26   : > { %1176 = vmatprep.mubr.msk.f32.mxu1 %vm253_vm0, %v214_v29 }
  0x28   : > { %1129 = vmatmul.mubr.msk.f32.gmra.mrb[8].mxu0 %vm253_vm0, %v183_v30 }
  0x29   : > { %1177 = vmatmul.mubr.msk.f32.gmra.mrb[8].mxu1 %vm253_vm0, %v215_v31  ;;  %1131 = vmatprep.mubr.msk.f32.mxu0 %vm253_vm0, %v184_v32 }
  0x2a   : > { %1179 = vmatprep.mubr.msk.f32.mxu1 %vm253_vm0, %v216_v33 }
  0x2c   : > { %1132 = vmatmul.mubr.msk.f32.gmra.mrb[10].mxu0 %vm253_vm0, %v185_v34 }
  0x2d   : > { %1180 = vmatmul.mubr.msk.f32.gmra.mrb[10].mxu1 %vm253_vm0, %v217_v35  ;;  %1134 = vmatprep.mubr.msk.f32.mxu0 %vm253_vm0, %v186_v36 }
  0x2e   : > { %1182 = vmatprep.mubr.msk.f32.mxu1 %vm253_vm0, %v218_v37 }
  0x30   : > { %1135 = vmatmul.mubr.msk.f32.gmra.mrb[12].mxu0 %vm253_vm0, %v187_v38 }
  0x31   : > { %1183 = vmatmul.mubr.msk.f32.gmra.mrb[12].mxu1 %vm253_vm0, %v219_v39  ;;  %1137 = vmatprep.mubr.msk.f32.mxu0 %vm253_vm0, %v188_v40 }
  0x32   : > { %1185 = vmatprep.mubr.msk.f32.mxu1 %vm253_vm0, %v220_v41 }
  0x34   : > { %1138 = vmatmul.mubr.msk.f32.gmra.mrb[14].mxu0 %vm253_vm0, %v189_v42 }
  0x35   : > { %1186 = vmatmul.mubr.msk.f32.gmra.mrb[14].mxu1 %vm253_vm0, %v221_v43  ;;  %1140 = vmatprep.mubr.msk.f32.mxu0 %vm253_vm0, %v190_v44 }
  0x36   : > { %1188 = vmatprep.mubr.msk.f32.mxu1 %vm253_vm0, %v222_v45 }
  0x38   : > { %1141 = vmatmul.mubr.msk.f32.gmra.mrb[16].mxu0 %vm253_vm0, %v191_v46 }
  0x39   : > { %1189 = vmatmul.mubr.msk.f32.gmra.mrb[16].mxu1 %vm253_vm0, %v223_v47  ;;  %1143 = vmatprep.mubr.msk.f32.mxu0 %vm253_vm0, %v192_v48 }
  0x3a   : > { %1191 = vmatprep.mubr.msk.f32.mxu1 %vm253_vm0, %v224_v49 }
  0x3c   : > { %1144 = vmatmul.mubr.msk.f32.gmra.mrb[18].mxu0 %vm253_vm0, %v193_v50 }
  0x3d   : > { %1192 = vmatmul.mubr.msk.f32.gmra.mrb[18].mxu1 %vm253_vm0, %v225_v51  ;;  %1146 = vmatprep.mubr.msk.f32.mxu0 %vm253_vm0, %v194_v52 }
  0x3e   : > { %1194 = vmatprep.mubr.msk.f32.mxu1 %vm253_vm0, %v226_v53 }
  0x40   : > { %1147 = vmatmul.mubr.msk.f32.gmra.mrb[20].mxu0 %vm253_vm0, %v195_v54 }
  0x41   : > { %1195 = vmatmul.mubr.msk.f32.gmra.mrb[20].mxu1 %vm253_vm0, %v227_v55  ;;  %1149 = vmatprep.mubr.msk.f32.mxu0 %vm253_vm0, %v196_v56 }
  0x42   : > { %1197 = vmatprep.mubr.msk.f32.mxu1 %vm253_vm0, %v228_v57 }
  0x44   : > { %1150 = vmatmul.mubr.msk.f32.gmra.mrb[22].mxu0 %vm253_vm0, %v197_v58 }
  0x45   : > { %1198 = vmatmul.mubr.msk.f32.gmra.mrb[22].mxu1 %vm253_vm0, %v229_v59  ;;  %1152 = vmatprep.mubr.msk.f32.mxu0 %vm253_vm0, %v198_v60 }
  0x46   : > { %1200 = vmatprep.mubr.msk.f32.mxu1 %vm253_vm0, %v230_v61 }
  0x48   : > { %1153 = vmatmul.mubr.msk.f32.gmra.mrb[24].mxu0 %vm253_vm0, %v199_v62 }
  0x49   : > { %1201 = vmatmul.mubr.msk.f32.gmra.mrb[24].mxu1 %vm253_vm0, %v231_v63  ;;  %1155 = vmatprep.mubr.msk.f32.mxu0 %vm253_vm0, %v200_v0 }
  0x4a   : > { %1203 = vmatprep.mubr.msk.f32.mxu1 %vm253_vm0, %v232_v1 }
  0x4c   : > { %1156 = vmatmul.mubr.msk.f32.gmra.mrb[26].mxu0 %vm253_vm0, %v201_v2 }
  0x4d   : > { %1204 = vmatmul.mubr.msk.f32.gmra.mrb[26].mxu1 %vm253_vm0, %v233_v3  ;;  %1158 = vmatprep.mubr.msk.f32.mxu0 %vm253_vm0, %v202_v4 }
  0x4e   : > { %1206 = vmatprep.mubr.msk.f32.mxu1 %vm253_vm0, %v234_v5 }
  0x50   : > { %1159 = vmatmul.mubr.msk.f32.gmra.mrb[28].mxu0 %vm253_vm0, %v203_v6 }
  0x51   : > { %1207 = vmatmul.mubr.msk.f32.gmra.mrb[28].mxu1 %vm253_vm0, %v235_v7  ;;  %1161 = vmatprep.mubr.msk.f32.mxu0 %vm253_vm0, %v204_v8 }
  0x52   : > { %1209 = vmatprep.mubr.msk.f32.mxu1 %vm253_vm0, %v236_v9 }
  0x54   : > { %1162 = vmatmul.mubr.msk.f32.gmra.mrb[30].mxu0 %vm253_vm0, %v205_v10 }
  0x55   : > { %1210 = vmatmul.mubr.msk.f32.gmra.mrb[30].mxu1 %vm253_vm0, %v237_v11 }
  0xeb   : > { %v1118_v13 = vpop.f32.mrb[0].mxu0 }
  0xec   : > { %v1166_v14 = vpop.f32.mrb[0].mxu1  ;;  %v518_v15 = vadd.f32 %v1118_v13, %v1445_v12  ;;  %v512_v17 = vpop.f32.mrb[1].mxu0 }
  0xed   : > { %v678_v16 = vadd.f32 %v1166_v14, %v1445_v12  ;;  %v672_v18 = vpop.f32.mrb[1].mxu1  ;;  %v513_v19 = vadd.f32 %v1445_v12, %v512_v17 }
  0xee   : > { %v673_v20 = vadd.f32 %v1445_v12, %v672_v18  ;;  %833 = vst.msk [vmem:[%s1452_s13 + $0x8] sm:$0xff] %vm831_vm1, %v518_v15 }
  0xef   : > { %865 = vst.msk [vmem:[%s1452_s13 + $0x108] sm:$0xff] %vm831_vm1, %v678_v16  ;;  %832 = vst.msk [vmem:[%s1452_s13] sm:$0xff] %vm831_vm1, %v513_v19  ;;  %v1121_v21 = vpop.f32.mrb[2].mxu0 }
  0xf0   : > { %864 = vst.msk [vmem:[%s1452_s13 + $0x100] sm:$0xff] %vm831_vm1, %v673_v20  ;;  %v1169_v22 = vpop.f32.mrb[2].mxu1  ;;  %v528_v23 = vadd.f32 %v1121_v21, %v1445_v12  ;;  %v522_v25 = vpop.f32.mrb[3].mxu0 }
  0xf1   : > { %v688_v24 = vadd.f32 %v1169_v22, %v1445_v12  ;;  %v682_v26 = vpop.f32.mrb[3].mxu1  ;;  %v523_v27 = vadd.f32 %v1445_v12, %v522_v25 }
  0xf2   : > { %v683_v28 = vadd.f32 %v1445_v12, %v682_v26  ;;  %835 = vst.msk [vmem:[%s1452_s13 + $0x18] sm:$0xff] %vm831_vm1, %v528_v23 }
  0xf3   : > { %867 = vst.msk [vmem:[%s1452_s13 + $0x118] sm:$0xff] %vm831_vm1, %v688_v24  ;;  %834 = vst.msk [vmem:[%s1452_s13 + $0x10] sm:$0xff] %vm831_vm1, %v523_v27  ;;  %v1124_v29 = vpop.f32.mrb[4].mxu0 }
  0xf4   : > { %866 = vst.msk [vmem:[%s1452_s13 + $0x110] sm:$0xff] %vm831_vm1, %v683_v28  ;;  %v1172_v30 = vpop.f32.mrb[4].mxu1  ;;  %v538_v31 = vadd.f32 %v1124_v29, %v1445_v12  ;;  %v532_v33 = vpop.f32.mrb[5].mxu0 }
  0xf5   : > { %v698_v32 = vadd.f32 %v1172_v30, %v1445_v12  ;;  %v692_v34 = vpop.f32.mrb[5].mxu1  ;;  %v533_v35 = vadd.f32 %v1445_v12, %v532_v33 }
  0xf6   : > { %v693_v36 = vadd.f32 %v1445_v12, %v692_v34  ;;  %837 = vst.msk [vmem:[%s1452_s13 + $0x28] sm:$0xff] %vm831_vm1, %v538_v31 }
  0xf7   : > { %869 = vst.msk [vmem:[%s1452_s13 + $0x128] sm:$0xff] %vm831_vm1, %v698_v32  ;;  %836 = vst.msk [vmem:[%s1452_s13 + $0x20] sm:$0xff] %vm831_vm1, %v533_v35  ;;  %v1127_v37 = vpop.f32.mrb[6].mxu0 }
  0xf8   : > { %868 = vst.msk [vmem:[%s1452_s13 + $0x120] sm:$0xff] %vm831_vm1, %v693_v36  ;;  %v1175_v38 = vpop.f32.mrb[6].mxu1  ;;  %v548_v39 = vadd.f32 %v1127_v37, %v1445_v12  ;;  %v542_v41 = vpop.f32.mrb[7].mxu0 }
  0xf9   : > { %v708_v40 = vadd.f32 %v1175_v38, %v1445_v12  ;;  %v702_v42 = vpop.f32.mrb[7].mxu1  ;;  %v543_v43 = vadd.f32 %v1445_v12, %v542_v41 }
  0xfa   : > { %v703_v44 = vadd.f32 %v1445_v12, %v702_v42  ;;  %839 = vst.msk [vmem:[%s1452_s13 + $0x38] sm:$0xff] %vm831_vm1, %v548_v39 }
  0xfb   : > { %871 = vst.msk [vmem:[%s1452_s13 + $0x138] sm:$0xff] %vm831_vm1, %v708_v40  ;;  %838 = vst.msk [vmem:[%s1452_s13 + $0x30] sm:$0xff] %vm831_vm1, %v543_v43  ;;  %v1130_v45 = vpop.f32.mrb[8].mxu0 }
  0xfc   : > { %870 = vst.msk [vmem:[%s1452_s13 + $0x130] sm:$0xff] %vm831_vm1, %v703_v44  ;;  %v1178_v46 = vpop.f32.mrb[8].mxu1  ;;  %v558_v47 = vadd.f32 %v1130_v45, %v1445_v12  ;;  %v552_v49 = vpop.f32.mrb[9].mxu0 }
  0xfd   : > { %v718_v48 = vadd.f32 %v1178_v46, %v1445_v12  ;;  %v712_v50 = vpop.f32.mrb[9].mxu1  ;;  %v553_v51 = vadd.f32 %v1445_v12, %v552_v49 }
  0xfe   : > { %v713_v52 = vadd.f32 %v1445_v12, %v712_v50  ;;  %841 = vst.msk [vmem:[%s1452_s13 + $0x48] sm:$0xff] %vm831_vm1, %v558_v47 }
  0xff   : > { %873 = vst.msk [vmem:[%s1452_s13 + $0x148] sm:$0xff] %vm831_vm1, %v718_v48  ;;  %840 = vst.msk [vmem:[%s1452_s13 + $0x40] sm:$0xff] %vm831_vm1, %v553_v51  ;;  %v1133_v53 = vpop.f32.mrb[10].mxu0 }
 0x100   : > { %872 = vst.msk [vmem:[%s1452_s13 + $0x140] sm:$0xff] %vm831_vm1, %v713_v52  ;;  %v1181_v54 = vpop.f32.mrb[10].mxu1  ;;  %v568_v55 = vadd.f32 %v1133_v53, %v1445_v12  ;;  %v562_v57 = vpop.f32.mrb[11].mxu0 }
 0x101   : > { %v728_v56 = vadd.f32 %v1181_v54, %v1445_v12  ;;  %v722_v58 = vpop.f32.mrb[11].mxu1  ;;  %v563_v59 = vadd.f32 %v1445_v12, %v562_v57 }
 0x102   : > { %v723_v60 = vadd.f32 %v1445_v12, %v722_v58  ;;  %843 = vst.msk [vmem:[%s1452_s13 + $0x58] sm:$0xff] %vm831_vm1, %v568_v55 }
 0x103   : > { %875 = vst.msk [vmem:[%s1452_s13 + $0x158] sm:$0xff] %vm831_vm1, %v728_v56  ;;  %842 = vst.msk [vmem:[%s1452_s13 + $0x50] sm:$0xff] %vm831_vm1, %v563_v59  ;;  %v1136_v61 = vpop.f32.mrb[12].mxu0 }
 0x104   : > { %874 = vst.msk [vmem:[%s1452_s13 + $0x150] sm:$0xff] %vm831_vm1, %v723_v60  ;;  %v1184_v62 = vpop.f32.mrb[12].mxu1  ;;  %v578_v63 = vadd.f32 %v1136_v61, %v1445_v12  ;;  %v572_v1 = vpop.f32.mrb[13].mxu0 }
 0x105   : > { %v738_v0 = vadd.f32 %v1184_v62, %v1445_v12  ;;  %v732_v2 = vpop.f32.mrb[13].mxu1  ;;  %v573_v3 = vadd.f32 %v1445_v12, %v572_v1 }
 0x106   : > { %v733_v4 = vadd.f32 %v1445_v12, %v732_v2  ;;  %845 = vst.msk [vmem:[%s1452_s13 + $0x68] sm:$0xff] %vm831_vm1, %v578_v63 }
 0x107   : > { %877 = vst.msk [vmem:[%s1452_s13 + $0x168] sm:$0xff] %vm831_vm1, %v738_v0  ;;  %844 = vst.msk [vmem:[%s1452_s13 + $0x60] sm:$0xff] %vm831_vm1, %v573_v3  ;;  %v1139_v5 = vpop.f32.mrb[14].mxu0 }
 0x108   : > { %876 = vst.msk [vmem:[%s1452_s13 + $0x160] sm:$0xff] %vm831_vm1, %v733_v4  ;;  %v1187_v6 = vpop.f32.mrb[14].mxu1  ;;  %v588_v7 = vadd.f32 %v1139_v5, %v1445_v12  ;;  %v582_v9 = vpop.f32.mrb[15].mxu0 }
 0x109   : > { %v748_v8 = vadd.f32 %v1187_v6, %v1445_v12  ;;  %v742_v10 = vpop.f32.mrb[15].mxu1  ;;  %v583_v11 = vadd.f32 %v1445_v12, %v582_v9 }
 0x10a   : > { %v743_v13 = vadd.f32 %v1445_v12, %v742_v10  ;;  %847 = vst.msk [vmem:[%s1452_s13 + $0x78] sm:$0xff] %vm831_vm1, %v588_v7 }
 0x10b   : > { %879 = vst.msk [vmem:[%s1452_s13 + $0x178] sm:$0xff] %vm831_vm1, %v748_v8  ;;  %846 = vst.msk [vmem:[%s1452_s13 + $0x70] sm:$0xff] %vm831_vm1, %v583_v11  ;;  %v1142_v14 = vpop.f32.mrb[16].mxu0 }
 0x10c   : > { %878 = vst.msk [vmem:[%s1452_s13 + $0x170] sm:$0xff] %vm831_vm1, %v743_v13  ;;  %v1190_v15 = vpop.f32.mrb[16].mxu1  ;;  %v598_v16 = vadd.f32 %v1142_v14, %v1445_v12  ;;  %v592_v18 = vpop.f32.mrb[17].mxu0 }
 0x10d   : > { %v758_v17 = vadd.f32 %v1190_v15, %v1445_v12  ;;  %v752_v19 = vpop.f32.mrb[17].mxu1  ;;  %v593_v20 = vadd.f32 %v1445_v12, %v592_v18 }
 0x10e   : > { %v753_v21 = vadd.f32 %v1445_v12, %v752_v19  ;;  %849 = vst.msk [vmem:[%s1452_s13 + $0x88] sm:$0xff] %vm831_vm1, %v598_v16 }
 0x10f   : > { %881 = vst.msk [vmem:[%s1452_s13 + $0x188] sm:$0xff] %vm831_vm1, %v758_v17  ;;  %848 = vst.msk [vmem:[%s1452_s13 + $0x80] sm:$0xff] %vm831_vm1, %v593_v20  ;;  %v1145_v22 = vpop.f32.mrb[18].mxu0 }
 0x110   : > { %880 = vst.msk [vmem:[%s1452_s13 + $0x180] sm:$0xff] %vm831_vm1, %v753_v21  ;;  %v1193_v23 = vpop.f32.mrb[18].mxu1  ;;  %v608_v24 = vadd.f32 %v1145_v22, %v1445_v12  ;;  %v602_v26 = vpop.f32.mrb[19].mxu0 }
 0x111   : > { %v768_v25 = vadd.f32 %v1193_v23, %v1445_v12  ;;  %v762_v27 = vpop.f32.mrb[19].mxu1  ;;  %v603_v28 = vadd.f32 %v1445_v12, %v602_v26 }
 0x112   : > { %v763_v29 = vadd.f32 %v1445_v12, %v762_v27  ;;  %851 = vst.msk [vmem:[%s1452_s13 + $0x98] sm:$0xff] %vm831_vm1, %v608_v24 }
 0x113   : > { %883 = vst.msk [vmem:[%s1452_s13 + $0x198] sm:$0xff] %vm831_vm1, %v768_v25  ;;  %850 = vst.msk [vmem:[%s1452_s13 + $0x90] sm:$0xff] %vm831_vm1, %v603_v28  ;;  %v1148_v30 = vpop.f32.mrb[20].mxu0 }
 0x114   : > { %882 = vst.msk [vmem:[%s1452_s13 + $0x190] sm:$0xff] %vm831_vm1, %v763_v29  ;;  %v1196_v31 = vpop.f32.mrb[20].mxu1  ;;  %v618_v32 = vadd.f32 %v1148_v30, %v1445_v12  ;;  %v612_v34 = vpop.f32.mrb[21].mxu0 }
 0x115   : > { %v778_v33 = vadd.f32 %v1196_v31, %v1445_v12  ;;  %v772_v35 = vpop.f32.mrb[21].mxu1  ;;  %v613_v36 = vadd.f32 %v1445_v12, %v612_v34 }
 0x116   : > { %v773_v37 = vadd.f32 %v1445_v12, %v772_v35  ;;  %853 = vst.msk [vmem:[%s1452_s13 + $0xa8] sm:$0xff] %vm831_vm1, %v618_v32 }
 0x117   : > { %885 = vst.msk [vmem:[%s1452_s13 + $0x1a8] sm:$0xff] %vm831_vm1, %v778_v33  ;;  %852 = vst.msk [vmem:[%s1452_s13 + $0xa0] sm:$0xff] %vm831_vm1, %v613_v36  ;;  %v1151_v38 = vpop.f32.mrb[22].mxu0 }
 0x118   : > { %884 = vst.msk [vmem:[%s1452_s13 + $0x1a0] sm:$0xff] %vm831_vm1, %v773_v37  ;;  %v1199_v39 = vpop.f32.mrb[22].mxu1  ;;  %v628_v40 = vadd.f32 %v1151_v38, %v1445_v12  ;;  %v622_v42 = vpop.f32.mrb[23].mxu0 }
 0x119   : > { %v788_v41 = vadd.f32 %v1199_v39, %v1445_v12  ;;  %v782_v43 = vpop.f32.mrb[23].mxu1  ;;  %v623_v44 = vadd.f32 %v1445_v12, %v622_v42 }
 0x11a   : > { %v783_v45 = vadd.f32 %v1445_v12, %v782_v43  ;;  %855 = vst.msk [vmem:[%s1452_s13 + $0xb8] sm:$0xff] %vm831_vm1, %v628_v40 }
 0x11b   : > { %887 = vst.msk [vmem:[%s1452_s13 + $0x1b8] sm:$0xff] %vm831_vm1, %v788_v41  ;;  %854 = vst.msk [vmem:[%s1452_s13 + $0xb0] sm:$0xff] %vm831_vm1, %v623_v44  ;;  %v1154_v46 = vpop.f32.mrb[24].mxu0 }
 0x11c   : > { %886 = vst.msk [vmem:[%s1452_s13 + $0x1b0] sm:$0xff] %vm831_vm1, %v783_v45  ;;  %v1202_v47 = vpop.f32.mrb[24].mxu1  ;;  %v638_v48 = vadd.f32 %v1154_v46, %v1445_v12  ;;  %v632_v50 = vpop.f32.mrb[25].mxu0 }
 0x11d   : > { %v798_v49 = vadd.f32 %v1202_v47, %v1445_v12  ;;  %v792_v51 = vpop.f32.mrb[25].mxu1  ;;  %v633_v52 = vadd.f32 %v1445_v12, %v632_v50 }
 0x11e   : > { %v793_v53 = vadd.f32 %v1445_v12, %v792_v51  ;;  %857 = vst.msk [vmem:[%s1452_s13 + $0xc8] sm:$0xff] %vm831_vm1, %v638_v48 }
 0x11f   : > { %889 = vst.msk [vmem:[%s1452_s13 + $0x1c8] sm:$0xff] %vm831_vm1, %v798_v49  ;;  %856 = vst.msk [vmem:[%s1452_s13 + $0xc0] sm:$0xff] %vm831_vm1, %v633_v52  ;;  %v1157_v54 = vpop.f32.mrb[26].mxu0 }
 0x120   : > { %888 = vst.msk [vmem:[%s1452_s13 + $0x1c0] sm:$0xff] %vm831_vm1, %v793_v53  ;;  %v1205_v55 = vpop.f32.mrb[26].mxu1  ;;  %v648_v56 = vadd.f32 %v1157_v54, %v1445_v12  ;;  %v642_v58 = vpop.f32.mrb[27].mxu0 }
 0x121   : > { %v808_v57 = vadd.f32 %v1205_v55, %v1445_v12  ;;  %v802_v59 = vpop.f32.mrb[27].mxu1  ;;  %v643_v60 = vadd.f32 %v1445_v12, %v642_v58 }
 0x122   : > { %v803_v61 = vadd.f32 %v1445_v12, %v802_v59  ;;  %859 = vst.msk [vmem:[%s1452_s13 + $0xd8] sm:$0xff] %vm831_vm1, %v648_v56 }
 0x123   : > { %891 = vst.msk [vmem:[%s1452_s13 + $0x1d8] sm:$0xff] %vm831_vm1, %v808_v57  ;;  %858 = vst.msk [vmem:[%s1452_s13 + $0xd0] sm:$0xff] %vm831_vm1, %v643_v60  ;;  %v1160_v62 = vpop.f32.mrb[28].mxu0 }
 0x124   : > { %890 = vst.msk [vmem:[%s1452_s13 + $0x1d0] sm:$0xff] %vm831_vm1, %v803_v61  ;;  %v1208_v63 = vpop.f32.mrb[28].mxu1  ;;  %v658_v0 = vadd.f32 %v1160_v62, %v1445_v12  ;;  %v652_v2 = vpop.f32.mrb[29].mxu0 }
 0x125   : > { %v818_v1 = vadd.f32 %v1208_v63, %v1445_v12  ;;  %v812_v3 = vpop.f32.mrb[29].mxu1  ;;  %v653_v4 = vadd.f32 %v1445_v12, %v652_v2 }
 0x126   : > { %v813_v5 = vadd.f32 %v1445_v12, %v812_v3  ;;  %861 = vst.msk [vmem:[%s1452_s13 + $0xe8] sm:$0xff] %vm831_vm1, %v658_v0 }
 0x127   : > { %893 = vst.msk [vmem:[%s1452_s13 + $0x1e8] sm:$0xff] %vm831_vm1, %v818_v1  ;;  %860 = vst.msk [vmem:[%s1452_s13 + $0xe0] sm:$0xff] %vm831_vm1, %v653_v4  ;;  %v1163_v6 = vpop.f32.mrb[30].mxu0 }
 0x128   : > { %892 = vst.msk [vmem:[%s1452_s13 + $0x1e0] sm:$0xff] %vm831_vm1, %v813_v5  ;;  %v1211_v7 = vpop.f32.mrb[30].mxu1  ;;  %v668_v8 = vadd.f32 %v1163_v6, %v1445_v12  ;;  %v662_v10 = vpop.f32.mrb[31].mxu0 }
 0x129   : > { %v828_v9 = vadd.f32 %v1211_v7, %v1445_v12  ;;  %v822_v11 = vpop.f32.mrb[31].mxu1  ;;  %v663_v13 = vadd.f32 %v1445_v12, %v662_v10 }
 0x12a   : > { %v823_v14 = vadd.f32 %v1445_v12, %v822_v11  ;;  %863 = vst.msk [vmem:[%s1452_s13 + $0xf8] sm:$0xff] %vm831_vm1, %v668_v8 }
 0x12b   : > { %895 = vst.msk [vmem:[%s1452_s13 + $0x1f8] sm:$0xff] %vm831_vm1, %v828_v9  ;;  %862 = vst.msk [vmem:[%s1452_s13 + $0xf0] sm:$0xff] %vm831_vm1, %v663_v13 }
 0x12c   : > { %894 = vst.msk [vmem:[%s1452_s13 + $0x1f0] sm:$0xff] %vm831_vm1, %v823_v14 }
 0x12d PF: > { %s13_s12 = sadd.s32 1, %s1250_s12  }
 0x12e   : > { %p10_p4 = scmp.ge.s32.totalorder %s13_s12, 4  }
 0x130   :  { %12 = sbr.rel (!%p10_p4) target bundleno = 1 (0x1), region = 62 }

</bundles_post_ra>
